<compile_context>
chip_gen: v7x
topology: tpu7x:2x2x1
jax: 0.10.0
libtpu: 0.0.40
codegen_flags: <defaults>
</compile_context>

<pallas_src>
import math
import functools

import jax
import jax.numpy as jnp
from jax import lax
from jax.experimental import pallas as pl
from jax.experimental.pallas import tpu as pltpu


def _attn_kernel(q_ref, k_ref, v_ref, o_ref, *, inv_scale):
    q = q_ref[...]            # (Lq, D)
    k = k_ref[...]            # (Lk, D)
    v = v_ref[...]            # (Lk, Dv)

    # scores = q @ k^T, contracting the last dim of both operands (no
    # materialized transpose); f32 accumulation on the MXU.
    s = lax.dot_general(
        q, k,
        dimension_numbers=(((1,), (1,)), ((), ())),
        preferred_element_type=jnp.float32,
    )                          # (Lq, Lk), f32

    # Static (trace-time) skip of the scale multiply when scale == 1.0
    # (key_dim=2, num_heads=2 -> sqrt(2 // 2) == 1.0).
    if inv_scale != 1.0:
        s = s * inv_scale

    # Numerically-stable softmax (max-subtracted, f32).
    m = jnp.max(s, axis=-1, keepdims=True)
    p = jnp.exp(s - m)                               # (Lq, Lk), unnormalized
    denom = jnp.sum(p, axis=-1, keepdims=True)       # (Lq, 1)

    # EUP approximate reciprocal (vrcp) + one Newton-Raphson refinement step
    # to recover near-f32 precision for two cheap VPU ops.
    r = pl.reciprocal(denom, approx=True)
    r = r * (2.0 - denom * r)

    # dropout with p = 0.0 is the identity -> elided.

    # Normalize whichever tensor is smaller (statically decided from shapes).
    # Here Lk << Dv, so scaling the (Lq, Lk) probabilities is the cheap side.
    lk = p.shape[-1]
    dv = v.shape[-1]
    if lk <= dv:
        p = p * r
        out = jnp.dot(p.astype(v.dtype), v, preferred_element_type=jnp.float32)
    else:
        out = jnp.dot(p.astype(v.dtype), v, preferred_element_type=jnp.float32)
        out = out * r

    o_ref[...] = out.astype(o_ref.dtype)


def sdpa_pallas(query, key, value, *, num_heads=2, key_dim=2):
    """softmax((q @ k^T) / sqrt(key_dim // num_heads)) @ v, batched over dim 0."""
    B, Lq, D = query.shape
    Bk, Lk, Dk = key.shape
    Bv, Lkv, Dv = value.shape
    assert B == Bk == Bv and D == Dk and Lk == Lkv
    assert key_dim >= num_heads, (
        "key_dim // num_heads must be >= 1 (PyTorch module would divide by 0)")

    scale = math.sqrt(key_dim // num_heads)
    inv_scale = 1.0 / scale

    kernel = functools.partial(_attn_kernel, inv_scale=inv_scale)

    out_dtype = query.dtype
    itemsize = lambda x: jnp.dtype(x.dtype).itemsize
    cost = pl.CostEstimate(
        flops=2 * B * Lq * Lk * D + 2 * B * Lq * Lk * Dv,
        transcendentals=B * Lq * Lk,                       # exp in the softmax
        bytes_accessed=(query.size * itemsize(query)
                        + key.size * itemsize(key)
                        + value.size * itemsize(value)
                        + B * Lq * Dv * jnp.dtype(out_dtype).itemsize),
    )

    # One grid step per batch element.  The batch axis is marked "parallel":
    # on v7x the two TensorCores each take a batch; on v5e/v6e (single TC) the
    # extra step cost is negligible and per-batch DMA pipelines with compute.
    return pl.pallas_call(
        kernel,
        out_shape=jax.ShapeDtypeStruct((B, Lq, Dv), out_dtype),
        grid=(B,),
        in_specs=[
            pl.BlockSpec((None, Lq, D), lambda b: (b, 0, 0)),
            pl.BlockSpec((None, Lk, D), lambda b: (b, 0, 0)),
            pl.BlockSpec((None, Lk, Dv), lambda b: (b, 0, 0)),
        ],
        out_specs=pl.BlockSpec((None, Lq, Dv), lambda b: (b, 0, 0)),
        compiler_params=pltpu.CompilerParams(
            dimension_semantics=("parallel",)),
        cost_estimate=cost,
    )(query, key, value)


def _reference(query, key, value, *, num_heads=2, key_dim=2):
    # f32 reference computed from the same (bf16) inputs.
    q = query.astype(jnp.float32)
    k = key.astype(jnp.float32)
    v = value.astype(jnp.float32)
    scale = math.sqrt(key_dim // num_heads)
    s = jnp.einsum("bqd,bkd->bqk", q, k) / scale
    p = jax.nn.softmax(s, axis=-1)
    return jnp.einsum("bqk,bkv->bqv", p, v)


if __name__ == "__main__":
    # Module hyper-params (as in the PyTorch script): num_heads=2, key_dim=2,
    # query_dim=2, dropout_p=0.0  -> scaling_factor = sqrt(2 // 2) = 1.0.
    # The module's Linear projections are never used in forward(), so they are
    # not materialized here.
    num_heads, query_dim, key_dim = 2, 2, 2

    # Small shapes consistent with the forward: (B, Lq, D) x (B, Lk, D) x (B, Lk, Dv).
    # D = Dv = 128 keeps the kernel output lane-dense (unmasked vector stores).
    # Inputs are bf16 to halve the HBM->VMEM DMA that dominates at this size;
    # all in-kernel accumulation stays f32.
    B, Lq, Lk, D, Dv = 2, 8, 8, 128, 128
    pkey = jax.random.PRNGKey(0)
    kq, kk, kv = jax.random.split(pkey, 3)
    query = jax.random.normal(kq, (B, Lq, D), jnp.float32).astype(jnp.bfloat16)
    key   = jax.random.normal(kk, (B, Lk, D), jnp.float32).astype(jnp.bfloat16)
    value = jax.random.normal(kv, (B, Lk, Dv), jnp.float32).astype(jnp.bfloat16)

    out = sdpa_pallas(query, key, value, num_heads=num_heads, key_dim=key_dim)
    out = jax.block_until_ready(out)

    ref = _reference(query, key, value, num_heads=num_heads, key_dim=key_dim)
    assert out.shape == (B, Lq, Dv)
    # bf16 inputs/outputs -> relaxed tolerance vs. the f32 reference.
    assert jnp.allclose(out.astype(jnp.float32), ref, atol=2e-2, rtol=2e-2)

    print("KERNEL_OK")
</pallas_src>

<mosaic_0001>
module attributes {stable_mosaic.version = 11 : i64} {
  func.func @_attn_kernel(%arg0: i32, %arg1: memref<1x8x128xbf16, #tpu.memory_space<vmem>>, %arg2: memref<1x8x128xbf16, #tpu.memory_space<vmem>>, %arg3: memref<1x8x128xbf16, #tpu.memory_space<vmem>>, %arg4: memref<1x8x128xbf16, #tpu.memory_space<vmem>>) attributes {dimension_semantics = [#tpu.dimension_semantics<parallel>], iteration_bounds = array<i64: 2>, scalar_prefetch = 0 : i64, scratch_operands = 0 : i64, tpu.core_type = #tpu.core_type<tc>, window_params = [{transform_indices = @transform_0, window_bounds = array<i64: 1, 8, 128>}, {transform_indices = @transform_1, window_bounds = array<i64: 1, 8, 128>}, {transform_indices = @transform_2, window_bounds = array<i64: 1, 8, 128>}, {transform_indices = @transform_3, window_bounds = array<i64: 1, 8, 128>}]} {
    %c0 = arith.constant 0 : index
    %c0_0 = arith.constant 0 : index
    %c0_1 = arith.constant 0 : index
    %0 = vector.load %arg1[%c0, %c0_0, %c0_1] : memref<1x8x128xbf16, #tpu.memory_space<vmem>>, vector<1x8x128xbf16>
    %1 = vector.shape_cast %0 : vector<1x8x128xbf16> to vector<8x128xbf16>
    %c0_2 = arith.constant 0 : index
    %c0_3 = arith.constant 0 : index
    %c0_4 = arith.constant 0 : index
    %2 = vector.load %arg2[%c0_2, %c0_3, %c0_4] : memref<1x8x128xbf16, #tpu.memory_space<vmem>>, vector<1x8x128xbf16>
    %3 = vector.shape_cast %2 : vector<1x8x128xbf16> to vector<8x128xbf16>
    %c0_5 = arith.constant 0 : index
    %c0_6 = arith.constant 0 : index
    %c0_7 = arith.constant 0 : index
    %4 = vector.load %arg3[%c0_5, %c0_6, %c0_7] : memref<1x8x128xbf16, #tpu.memory_space<vmem>>, vector<1x8x128xbf16>
    %5 = vector.shape_cast %4 : vector<1x8x128xbf16> to vector<8x128xbf16>
    %cst = arith.constant dense<0.000000e+00> : vector<8x8xf32>
    %6 = tpu.matmul %1, %3, %cst {dimension_numbers = #tpu.dot_dimension_numbers<[1], [1], [0], [0], [0, 0, 1, 0], [], []>} : vector<8x128xbf16>, vector<8x128xbf16>, vector<8x8xf32> -> vector<8x8xf32>
    %cst_8 = arith.constant dense<0xFF800000> : vector<8xf32>
    %7 = vector.multi_reduction <maximumf>, %6, %cst_8 [1] : vector<8x8xf32> to vector<8xf32>
    %8 = vector.shape_cast %7 : vector<8xf32> to vector<8x1xf32>
    %9 = vector.broadcast %8 : vector<8x1xf32> to vector<8x8xf32>
    %10 = arith.subf %6, %9 : vector<8x8xf32>
    %11 = math.exp %10 : vector<8x8xf32>
    %cst_9 = arith.constant dense<0.000000e+00> : vector<8xf32>
    %12 = vector.multi_reduction <add>, %11, %cst_9 [1] : vector<8x8xf32> to vector<8xf32>
    %13 = vector.shape_cast %12 : vector<8xf32> to vector<8x1xf32>
    %14 = tpu.reciprocal %13 {approx = true} : vector<8x1xf32> -> vector<8x1xf32>
    %15 = arith.mulf %13, %14 : vector<8x1xf32>
    %cst_10 = arith.constant 2.000000e+00 : f32
    %16 = vector.broadcast %cst_10 : f32 to vector<8x1xf32>
    %17 = arith.subf %16, %15 : vector<8x1xf32>
    %18 = arith.mulf %14, %17 : vector<8x1xf32>
    %19 = vector.broadcast %18 : vector<8x1xf32> to vector<8x8xf32>
    %20 = arith.mulf %11, %19 : vector<8x8xf32>
    %21 = arith.truncf %20 : vector<8x8xf32> to vector<8x8xbf16>
    %cst_11 = arith.constant dense<0.000000e+00> : vector<8x128xf32>
    %22 = tpu.matmul %21, %5, %cst_11 {dimension_numbers = #tpu.dot_dimension_numbers<[1], [0], [0], [1], [0, 0, 1, 1], [], []>} : vector<8x8xbf16>, vector<8x128xbf16>, vector<8x128xf32> -> vector<8x128xf32>
    %23 = arith.truncf %22 : vector<8x128xf32> to vector<8x128xbf16>
    %c0_12 = arith.constant 0 : index
    %c0_13 = arith.constant 0 : index
    %c0_14 = arith.constant 0 : index
    %24 = vector.load %arg4[%c0_12, %c0_13, %c0_14] : memref<1x8x128xbf16, #tpu.memory_space<vmem>>, vector<1x8x128xbf16>
    %25 = vector.shape_cast %24 : vector<1x8x128xbf16> to vector<8x128xbf16>
    %26 = vector.shape_cast %23 : vector<8x128xbf16> to vector<1x8x128xbf16>
    tpu.vector_store %arg4[%c0_12, %c0_13, %c0_14], %26 {strides = array<i32>} : memref<1x8x128xbf16, #tpu.memory_space<vmem>>, vector<1x8x128xbf16>,
    return
  }
  func.func @transform_0(%arg0: i32) -> (i32, i32, i32) {
    %c0_i32 = arith.constant 0 : i32
    %c0_i32_0 = arith.constant 0 : i32
    %c0_i32_1 = arith.constant 0 : i32
    return %arg0, %c0_i32, %c0_i32_0 : i32, i32, i32
  }
  func.func @transform_1(%arg0: i32) -> (i32, i32, i32) {
    %c0_i32 = arith.constant 0 : i32
    %c0_i32_0 = arith.constant 0 : i32
    %c0_i32_1 = arith.constant 0 : i32
    return %arg0, %c0_i32, %c0_i32_0 : i32, i32, i32
  }
  func.func @transform_2(%arg0: i32) -> (i32, i32, i32) {
    %c0_i32 = arith.constant 0 : i32
    %c0_i32_0 = arith.constant 0 : i32
    %c0_i32_1 = arith.constant 0 : i32
    return %arg0, %c0_i32, %c0_i32_0 : i32, i32, i32
  }
  func.func @transform_3(%arg0: i32) -> (i32, i32, i32) {
    %c0_i32 = arith.constant 0 : i32
    %c0_i32_0 = arith.constant 0 : i32
    %c0_i32_1 = arith.constant 0 : i32
    return %arg0, %c0_i32, %c0_i32_0 : i32, i32, i32
  }
}

</mosaic_0001>

<bundles_post_ra>
// kernel: tpu_custom_call.1
= control target key start
LH: loop header
LB: loop body
LE: loop exit
PB: predicated region body
PF: predicated region fallthrough
CT: control target
= control target key end

     0   :  { %s1016_s0 = inlined_call_operand.hbm [shape: bf16[2,8,128], index: 0, kind: input, shape index: {}]   ;;  %s1017_s1 = inlined_call_operand.hbm [shape: bf16[2,8,128], index: 1, kind: input, shape index: {}]   ;;  %s1018_s2 = inlined_call_operand.hbm [shape: bf16[2,8,128], index: 2, kind: input, shape index: {}]   ;;  %s1019_s3 = inlined_call_operand.hbm [shape: bf16[2,8,128], index: 3, kind: output, shape index: {}]  }
   0x1   :  { %1024 = sst [smem:[#allocation12_spill]] %s1017_s1 }
   0x2   :  { %8 = vsyncpa [#allocation3], 0 }
   0x3   :  { %10 = vsyncpa [#allocation3 + $0x1], 0 }
   0x4   :  { %11 = vsyncpa [#allocation6], 0 }
   0x5   :  { %13 = vsyncpa [#allocation6 + $0x1], 0 }
   0x6   :  { %14 = vsyncpa [#allocation4], 0 }
   0x7   :  { %16 = vsyncpa [#allocation4 + $0x1], 0  ;;  %s778_s12 = smov 0   ;;  %s780_s13 = smov 0  }
   0x8   :  { %s782_s14 = smov 0   ;;  %s784_s15 = smov 0  }
   0x9 LB: > { %s799_s16 = sadd.s32 4294967295, %s750_s15   ;;  %s493_s17 = sadd.s32 4294967294, %s750_s15   ;;  %s750_s15 = sphi %s784_s15, %s1043_s15   ;;  %s746_s14 = sphi %s782_s14, %s1042_s14   ;;  %s742_s13 = sphi %s780_s13, %s1041_s13   ;;  %s738_s12 = sphi %s778_s12, %s1040_s12  }
   0xa   : > { %s803_s18 = sadd.s32 1, %s750_s15   ;;  %s29_s19 = sadd.s32 1, %s746_s14 }
   0xb   : > { %s26_s20 = ssub.s32 %s750_s15, %s803_s18  ;;  %p36_p0 = scmp.ne.s32.totalorder %s746_s14, %s742_s13 }
   0xc   : > { %p27_p1 = scmp.eq.s32.totalorder %s26_s20, 0  ;;  %p37_p2 = scmp.eq.s32.totalorder %s750_s15, 0 }
   0xd   : > { %p42_p3 = scmp.ne.s32.totalorder %s742_s13, %s738_s12  ;;  %p43_p4 = scmp.eq.s32.totalorder %s799_s16, 0 }
   0xe   : > { %s815_s21 = scalar_select %p27_p1, %s746_s14, %s29_s19  }
   0xf   : > { %p38_p5 = por %p37_p2, %p36_p0  ;;  %p817_p6 = por %p43_p4, %p42_p3 }
  0x10   : > { %p118_p7 = scmp.eq.s32.totalorder %s799_s16, 1  ;;  %p124_p8 = scmp.eq.s32.totalorder %s493_s17, 1 }
  0x11   : > { %s1025_s22 = scalar_select %p817_p6, 1, 0 }
  0x12   : > { %p550_p10 = scmp.lt.s32.totalorder %s750_s15, 2  ;;  %p824_p11 = por %p118_p7, %p36_p0 }
  0x13   : > { %p828_p12 = por %p124_p8, %p42_p3  ;;  %s144_s25 = sand.u32 1, %s746_s14  }
  0x14   : > { %s1026_s23 = scalar_select %p824_p11, 1, 0 }
  0x15   : > { %s1027_s24 = scalar_select %p828_p12, 1, 0 }
  0x16   : > { %s834_s26 = sshll.u32 %s750_s15, 6  ;;  %s838_s27 = sshll.u32 %s144_s25, 2 }
  0x17   : > { %p840_p13 = pnand %p550_p10, %p38_p5  ;;  %s162_s29 = sand.u32 1, %s750_s15  }
  0x18   : > { %s1029_s1 = sld [smem:[#allocation12_spill]]  ;;  %s166_s6 = scalar_lea.vmem [#allocation5], %s838_s27 }
  0x19   : > { %s1028_s28 = scalar_select %p840_p13, 1, 0 }
  0x1a   : > { %s173_s7 = sshll.u32 %s166_s6, 4  ;;  %s855_s8 = scalar_lea.sflag [#allocation6], %s162_s29  ;;  %s852_s7 = int_to_ptr.vmem [resolvable:$true] %s173_s7 }
  0x1b   : > { %p861_p2 = pneg %p840_p13 }
  0x1e   : > { %s849_s5 = scalar_lea.hbm %s1029_s1, %s834_s26  ;;  %s595_s19 = scalar_lea.hbm %s1029_s1, 128 }
  0x1f   : > { %s590_s9 = scalar_lea.hbm %s849_s5, 64  ;;  %p596_p5 = scmp.lt.u32.totalorder %s849_s5, %s1029_s1 }
  0x20   : > { %p591_p1 = scmp.ne.s32.totalorder %s849_s5, %s590_s9  ;;  %p597_p7 = scmp.lt.u32.totalorder %s595_s19, %s590_s9 }
  0x21   : > { %p599_p10 = scmp.lt.u32.totalorder %s590_s9, %s849_s5 }
  0x22   : > { %p593_p3 = pnand %p861_p2, %p591_p1  ;;  %p598_p8 = por %p597_p7, %p596_p5 }
  0x24   : > { %p594_p4 = pneg %p593_p3  ;;  %p600_p9 = por %p599_p10, %p598_p8 }
  0x26   : > { %p601_p0 = pnand %p600_p9, %p594_p4 }
  0x28   : > { %604 = shalt.err (!%p601_p0)
}
  0x29   : > { %s605_s29 = scalar_lea.vmem %s852_s7, 64  ;;  %s752_s4 = smov [#allocation5]  }
  0x2a   : > { %p606_p1 = scmp.ne.s32.totalorder %s852_s7, %s605_s29  ;;  %s610_s6 = sshll.u32 %s752_s4, 4  ;;  %s611_s6 = int_to_ptr.vmem [resolvable:$false] %s610_s6 }
  0x2b   : > { %s612_s11 = scalar_lea.vmem %s611_s6, 128  ;;  %p613_p11 = scmp.lt.s32.totalorder %s852_s7, %s611_s6 }
  0x2c   : > { %p608_p3 = pnand %p606_p1, %p861_p2  ;;  %p614_p6 = scmp.lt.s32.totalorder %s612_s11, %s605_s29 }
  0x2e   : > { %p609_p12 = pneg %p608_p3  ;;  %p615_p5 = por %p614_p6, %p613_p11 }
  0x30   : > { %p616_p7 = pnand %p615_p5, %p609_p12 }
  0x32   : > { %619 = shalt.err (!%p616_p7)
}
  0x33   : > { %542 = dma.hbm_to_vmem [thread:$0]  (!%p840_p13), %s849_s5, 64, %s852_s7, %s855_s8  }
  0x34   : > { %p196_p9 = scmp.lt.s32.totalorder %s750_s15, 3  ;;  %s890_s19 = scalar_lea.hbm %s1016_s0, %s834_s26 }
  0x35   : > { %p1031_p6 = scmp.ge.s32.totalorder %s750_s15, 1  ;;  %s148_s30 = scalar_lea.vmem [#allocation2], %s838_s27 }
  0x36   : > { %s155_s29 = sshll.u32 %s148_s30, 4  ;;  %s145_s5 = scalar_lea.sflag [#allocation3], %s144_s25  ;;  %s156_s29 = int_to_ptr.vmem [resolvable:$true] %s155_s29 }
  0x37   : > { %p894_p11 = pnand %p1031_p6, %p196_p9  ;;  %s620_s7 = scalar_lea.hbm %s890_s19, 64 }
  0x38   : > { %p621_p12 = scmp.ne.s32.totalorder %s890_s19, %s620_s7  ;;  %s625_s11 = scalar_lea.hbm %s1016_s0, 128 }
  0x39   : > { %s1032_s20 = scalar_select %p894_p11, 1, 0 }
  0x3a   : > { %p623_p0 = pnand %p621_p12, %p861_p2  ;;  %p626_p8 = scmp.lt.u32.totalorder %s890_s19, %s1016_s0 }
  0x3b   : > { %p627_p10 = scmp.lt.u32.totalorder %s625_s11, %s620_s7  ;;  %p629_p3 = scmp.lt.u32.totalorder %s620_s7, %s890_s19 }
  0x3c   : > { %p624_p4 = pneg %p623_p0 }
  0x3d   : > { %p628_p1 = por %p627_p10, %p626_p8 }
  0x3f   : > { %p630_p5 = por %p629_p3, %p628_p1 }
  0x41   : > { %p631_p7 = pnand %p630_p5, %p624_p4 }
  0x43   : > { %634 = shalt.err (!%p631_p7)
}
  0x44   : > { %s635_s25 = scalar_lea.vmem %s156_s29, 64  ;;  %s753_s30 = smov [#allocation2]  }
  0x45   : > { %p636_p9 = scmp.ne.s32.totalorder %s156_s29, %s635_s25  ;;  %s640_s1 = sshll.u32 %s753_s30, 4  ;;  %s641_s1 = int_to_ptr.vmem [resolvable:$false] %s640_s1 }
  0x46   : > { %s642_s4 = scalar_lea.vmem %s641_s1, 128  ;;  %p643_p0 = scmp.lt.s32.totalorder %s156_s29, %s641_s1 }
  0x47   : > { %p638_p6 = pnand %p636_p9, %p861_p2  ;;  %p644_p11 = scmp.lt.s32.totalorder %s642_s4, %s635_s25 }
  0x49   : > { %p639_p12 = pneg %p638_p6  ;;  %p645_p13 = por %p644_p11, %p643_p0 }
  0x4b   : > { %p646_p8 = pnand %p645_p13, %p639_p12 }
  0x4d   : > { %649 = shalt.err (!%p646_p8)
}
  0x4e   : > { %p1033_p10 = scmp.ne.s32.totalorder %s1028_s28, 0  ;;  %s922_s11 = scalar_lea.hbm %s1018_s2, %s834_s26 }
  0x4f   : > { %s184_s1 = scalar_lea.vmem [#allocation7], %s838_s27  ;;  %s650_s17 = scalar_lea.hbm %s922_s11, 64 }
  0x50   : > { %539 = dma.hbm_to_vmem [thread:$0]  (!%p1033_p10), %s890_s19, 64, %s156_s29, %s145_s5  }
  0x51   : > { %s191_s9 = sshll.u32 %s184_s1, 4  ;;  %p651_p13 = scmp.ne.s32.totalorder %s922_s11, %s650_s17  ;;  %s192_s9 = int_to_ptr.vmem [resolvable:$true] %s191_s9 }
  0x52   : > { %s655_s19 = scalar_lea.hbm %s1018_s2, 128  ;;  %p656_p1 = scmp.lt.u32.totalorder %s922_s11, %s1018_s2 }
  0x53   : > { %p653_p11 = pnand %p651_p13, %p861_p2  ;;  %p657_p3 = scmp.lt.u32.totalorder %s655_s19, %s650_s17 }
  0x54   : > { %p659_p7 = scmp.lt.u32.totalorder %s650_s17, %s922_s11 }
  0x55   : > { %p654_p4 = pneg %p653_p11  ;;  %p658_p5 = por %p657_p3, %p656_p1 }
  0x57   : > { %p660_p9 = por %p659_p7, %p658_p5 }
  0x59   : > { %p661_p6 = pnand %p660_p9, %p654_p4 }
  0x5b   : > { %664 = shalt.err (!%p661_p6)
}
  0x5c   : > { %s665_s26 = scalar_lea.vmem %s192_s9, 64  ;;  %s754_s27 = smov [#allocation7]  }
  0x5d   : > { %p666_p12 = scmp.ne.s32.totalorder %s192_s9, %s665_s26  ;;  %s670_s4 = sshll.u32 %s754_s27, 4  ;;  %s671_s4 = int_to_ptr.vmem [resolvable:$false] %s670_s4 }
  0x5e   : > { %s672_s7 = scalar_lea.vmem %s671_s4, 128  ;;  %p673_p13 = scmp.lt.s32.totalorder %s192_s9, %s671_s4 }
  0x5f   : > { %p668_p0 = pnand %p666_p12, %p861_p2  ;;  %p674_p11 = scmp.lt.s32.totalorder %s672_s7, %s665_s26 }
  0x61   : > { %p669_p8 = pneg %p668_p0  ;;  %p675_p10 = por %p674_p11, %p673_p13 }
  0x63   : > { %p676_p1 = pnand %p675_p10, %p669_p8 }
  0x65   : > { %679 = shalt.err (!%p676_p1)
}
  0x66   : > { %p1034_p3 = scmp.ne.s32.totalorder %s1028_s28, 0  ;;  %p1035_p4 = scmp.ne.s32.totalorder %s1032_s20, 0 }
  0x67   : > { %s946_s10 = sand.u32 (!%p1035_p4), 1, %s742_s13   ;;  %p1036_p2 = scmp.ne.s32.totalorder (!%p1035_p4), %s1025_s22, 0 }
  0x68   : > { %545 = dma.hbm_to_vmem [thread:$0]  (!%p1034_p3), %s922_s11, 64, %s192_s9, %s855_s8  }
  0x69   : > { %200 = sbr.rel (%p1035_p4) target bundleno = 888 (0x378), region = 32  ;;  %s949_s6 = sshll.u32 (!%p1035_p4), %s946_s10, 2 }
  0x6a   : > { %s203_s1 = scalar_lea.sflag (!%p1035_p4), [#allocation3], %s946_s10  ;;  %s206_s17 = scalar_lea.vmem (!%p1035_p4), [#allocation2], %s949_s6 }
  0x70   : > { %725 = dma.done.wait (%p1036_p2), %s203_s1, 64  }
  0x71   : > { %727 = vsyncadd (%p1036_p2), %s203_s1, 4294967232  ;;  %s211_s28 = sand.u32 1, %s799_s16   ;;  %s215_s20 = scalar_lea.vmem [#allocation5], %s949_s6 }
  0x72   : > { %s212_s8 = scalar_lea.sflag [#allocation6], %s211_s28 }
  0x73   : > { %729 = dma.done.wait (%p1036_p2), %s212_s8, 128  }
  0x74   : > { %731 = vsyncadd (%p1036_p2), %s212_s8, 4294967168  ;;  %v755_v0 = vmov 0.0   ;;  %vm756_vm0 = vmmov 0   ;;  %v259_v1 = vld [vmem:[%s215_s20] sm:$0xf]  ;;  %vm301_vm1 = vcmask 64512  }
  0x75   : > { %516 = vmatprep.subr.bf16.mxu0 %v755_v0  ;;  %518 = vmatprep.mubr.msk.bf16.mxu0 %vm756_vm0, %v755_v0  ;;  %v258_v2 = vld [vmem:[%s206_s17] sm:$0xf]  ;;  %s224_s22 = scalar_lea.vmem [#allocation7], %s949_s6  ;;  %vm320_vm2 = vcmask 1043456   ;;  %s509_s11 = sshll.u32 %s799_s16, 6 }
  0x76   : > { %522 = vmatprep.subr.bf16.mxu1 %v755_v0  ;;  %524 = vmatprep.mubr.msk.bf16.mxu1 %vm756_vm0, %v755_v0  ;;  %v260_v13 = vld [vmem:[%s224_s22] sm:$0xf]  ;;  %s256_s9 = scalar_lea.vmem [#allocation8], %s949_s6  ;;  %s972_s29 = scalar_lea.hbm %s1019_s3, %s509_s11 }
  0x77   : > { %517 = vmatpush3.bf16.xpose.msra.mxu0 %v259_v1  ;;  %v322_v14 = vsel %vm320_vm2, %v260_v13, 0  ;;  %s380_s25 = sshll.u32 %s256_s9, 4  ;;  %s367_s5 = scalar_lea.sflag [#allocation4], %s946_s10  ;;  %s974_s25 = int_to_ptr.vmem [resolvable:$true] %s380_s25 }
  0x78   : > { %523 = vmatpush3.bf16.msra.mxu1 %v322_v14  ;;  %s680_s16 = scalar_lea.vmem %s974_s25, 64  ;;  %p1037_p5 = scmp.ne.s32.totalorder %s1026_s23, 0 }
  0x79   : > { %p681_p10 = scmp.ne.s32.totalorder %s974_s25, %s680_s16  ;;  %s757_s26 = smov [#allocation8]  }
  0x7a   : > { %s684_s27 = sshll.u32 %s757_s26, 4  ;;  %s685_s27 = int_to_ptr.vmem [resolvable:$false] %s684_s27 }
  0x7b   : > { %p682_p7 = pnand %p681_p10, %p1037_p5  ;;  %s686_s4 = scalar_lea.vmem %s685_s27, 128 }
  0x7c   : > { %p687_p6 = scmp.lt.s32.totalorder %s974_s25, %s685_s27  ;;  %p688_p12 = scmp.lt.s32.totalorder %s686_s4, %s680_s16 }
  0x7d   : > { %p683_p9 = pneg %p682_p7 }
  0x7e   : > { %519 = vmatmul.mubr.bf16.vlgmr.msra.gmra.mrb[0].mxu0 %v258_v2  ;;  %p689_p0 = por %p688_p12, %p687_p6 }
  0x80   : > { %p690_p8 = pnand %p689_p0, %p683_p9 }
 0x151   : > { %v295_v3 = vpop.f32.mrb[0].mxu0 }
 0x152   : > { %v520_v4 = vpop.f32.mrb[1].mxu0  ;;  %v302_v5 = vsel %vm301_vm1, %v295_v3, -inf }
 0x153   : > { %303 = vmax.xlane.f32.xlu0 %v302_v5  ;;  %v298_v6 = vpop.f32.mrb[2].mxu0 }
 0x154   : > { %v521_v7 = vpop.f32.mrb[3].mxu0 }
 0x1e0   : > { %v304_v8 = vpop.xlane.xlu0 %303 }
 0x1e1   : > { %v305_v9 = vsub.f32 %v295_v3, %v304_v8 }
 0x1e3   : > { %v306_v10 = vmul.f32 1.442695, %v305_v9 }
 0x1e5   : > { %586 = vpow2.f32 %v306_v10 }
 0x1ef   : > { %v587_v11 = vpop.eup %586 }
 0x1f0   : > { %v308_v12 = vsel %vm301_vm1, %v587_v11, 0.0 }
 0x1f1   : > { %309 = vadd.xlane.f32.xlu0 %v308_v12 }
 0x27e   : > { %v310_v15 = vpop.xlane.xlu0 %309 }
 0x27f   : > { %588 = vrcp.f32 %v310_v15 }
 0x289   : > { %v589_v16 = vpop.eup %588 }
 0x28a   : > { %v312_v17 = vmul.f32 %v589_v16, %v310_v15 }
 0x28c   : > { %v313_v18 = vsub.f32 2.0, %v312_v17 }
 0x28e   : > { %v314_v19 = vmul.f32 %v589_v16, %v313_v18 }
 0x290   : > { %v315_v20 = vmul.f32 %v587_v11, %v314_v19 }
 0x292   : > { %v316_v21 = vpack.c.bf16 %v315_v20, %v315_v20 }
 0x294   : > { %525 = vmatmul.mubr.msk.bf16.vlgmr.msra.gmra.mrb[0].mxu1 %vm301_vm1, %v316_v21 }
 0x367   : > { %v358_v22 = vpop.f32.mrb[0].mxu1 }
 0x368   : > { %v364_v23 = vpack.c.bf16 %v358_v22, %v358_v22  ;;  %v526_v24 = vpop.f32.mrb[1].mxu1 }
 0x369   : > { %v361_v25 = vpop.f32.mrb[2].mxu1 }
 0x36a   : > { %365 = vst [vmem:[%s256_s9] sm:$0xf] %v364_v23  ;;  %v527_v26 = vpop.f32.mrb[3].mxu1 }
 0x36b   : > { %693 = shalt.err (!%p690_p8)
}
 0x36c   : > { %s694_s7 = scalar_lea.hbm %s972_s29, 64  ;;  %s698_s1 = scalar_lea.hbm %s1019_s3, 128 }
 0x36d   : > { %p695_p13 = scmp.ne.s32.totalorder %s972_s29, %s694_s7  ;;  %p699_p3 = scmp.lt.u32.totalorder %s972_s29, %s1019_s3 }
 0x36e   : > { %p700_p4 = scmp.lt.u32.totalorder %s698_s1, %s694_s7  ;;  %p702_p10 = scmp.lt.u32.totalorder %s694_s7, %s972_s29 }
 0x36f   : > { %p696_p11 = pnand %p695_p13, %p1037_p5 }
 0x370   : > { %p701_p2 = por %p700_p4, %p699_p3 }
 0x371   : > { %p697_p1 = pneg %p696_p11 }
 0x372   : > { %p703_p7 = por %p702_p10, %p701_p2 }
 0x374   : > { %p704_p9 = pnand %p703_p7, %p697_p1 }
 0x376   : > { %707 = shalt.err (!%p704_p9)
}
 0x377   : > { %534 = dma.vmem_to_hbm [thread:$0]  (%p1037_p5), %s974_s25, 64, %s972_s29, %s367_s5  }
 0x378 PF: > { %s392_s8 = sand.u32 1, %s738_s12   ;;  %p1038_p6 = scmp.ne.s32.totalorder %s1027_s24, 0 }
 0x379   : > { %p1039_p12 = scmp.ge.s32.totalorder %s750_s15, 2  ;;  %s393_s20 = scalar_lea.sflag [#allocation4], %s392_s8 }
 0x37b   : > { %p547_p0 = pnand %p1039_p12, %p1038_p6 }
 0x37d   : > { %733 = dma.done.wait (!%p547_p0), %s393_s20, 64  }
 0x37e   : > { %735 = vsyncadd (!%p547_p0), %s393_s20, 4294967232  ;;  %p19_p8 = scmp.ge.s32.totalorder %s803_s18, 4   ;;  %s1040_s12 = smov %s742_s13 }
 0x37f   : > { %s1041_s13 = smov %s746_s14  ;;  %s1042_s14 = smov %s815_s21 }
 0x380   : > { %s1043_s15 = smov %s803_s18  ;;  %21 = sbr.rel (!%p19_p8) target bundleno = 9 (0x9), region = 101 }
 0x387   :  { %398 = vsyncpa [#allocation3], 1 }
 0x388   :  { %400 = vsyncpa [#allocation3 + $0x1], 1 }
 0x389   :  { %401 = vsyncpa [#allocation6], 1 }
 0x38a   :  { %403 = vsyncpa [#allocation6 + $0x1], 1 }
 0x38b   :  { %404 = vsyncpa [#allocation4], 1 }
 0x38c   :  { %406 = vsyncpa [#allocation4 + $0x1], 1 }

</bundles_post_ra>
